<compile_context>
chip_gen: v5e
topology: v5e:2x2
jax: 0.10.0
libtpu: 0.0.40
codegen_flags: <defaults>
</compile_context>

<pallas_src>
import functools

import jax
import jax.numpy as jnp
from jax.experimental import pallas as pl
from jax.experimental.pallas import tpu as pltpu


def _char_rnn_kernel(xp_ref, h0_ref, w_ih_ref, w_hh_ref, b_ref, w_fc_ref, b_fc_ref,
                     y_ref, hout_ref, hall_scratch, *, n_layers, seq_len):
    """Single-invocation kernel.

    xp_ref:   (B, T, H) layer-0 pre-activations: emb(token) @ W_ih[0]^T + b0 (folded)
    h0_ref:   (L, B, H) initial hidden state
    w_ih_ref: (L, H, H) input weights, pre-transposed (only layers >= 1 are used)
    w_hh_ref: (L, H, H) recurrent weights, pre-transposed
    b_ref:    (L, 1, H) pre-summed biases b_ih + b_hh (only layers >= 1 are used)
    w_fc_ref: (H, O)    FC weight, pre-transposed
    b_fc_ref: (1, O)    FC bias
    y_ref:    (B*T, O)  logits, already in PyTorch's flattened layout
    hout_ref: (L, B, H) final hidden state
    """
    # Hidden state lives in vregs across the fully unrolled recurrence.
    h = [h0_ref[l] for l in range(n_layers)]                     # each (B, H)

    # ---- Serial recurrence over time: static indices only (LLO sees all). ----
    for t in range(seq_len):
        x_in = xp_ref[:, t, :]                                   # (B, H), static slice
        for layer in range(n_layers):
            if layer == 0:
                # Input projection + biases were folded into xp in the wrapper.
                pre = x_in + jnp.dot(h[0], w_hh_ref[0],
                                     preferred_element_type=jnp.float32)
            else:
                # Deeper layers consume the same-timestep output of the layer
                # below, so their input projection cannot be hoisted.
                pre = (jnp.dot(x_in, w_ih_ref[layer],
                               preferred_element_type=jnp.float32)
                       + jnp.dot(h[layer], w_hh_ref[layer],
                                 preferred_element_type=jnp.float32)
                       + b_ref[layer])
            x_in = jnp.tanh(pre)
            h[layer] = x_in
        # Lane-dense (H-wide) store of the top-layer hidden state; FC deferred.
        hall_scratch[:, t, :] = x_in

    # ---- Deferred FC head: one flattened (B*T, H) x (H, O) GEMM. ----
    hs = hall_scratch[...]                                       # (B, T, H)
    flat = hs.reshape(hs.shape[0] * hs.shape[1], hs.shape[2])    # leading-dim merge, free
    y_ref[...] = (jnp.dot(flat, w_fc_ref[...],
                          preferred_element_type=jnp.float32)
                  + b_fc_ref[...]).astype(y_ref.dtype)

    for l in range(n_layers):
        hout_ref[l] = h[l].astype(hout_ref.dtype)


def char_rnn_forward(token_ids, hidden, params):
    """Mirrors CharRNN.forward.

    token_ids: (B, T) int32
    hidden:    (n_layers, B, H) f32
    returns (output (B*T, O), hidden (n_layers, B, H))
    """
    emb_tbl = params["embedding"]          # (V, H)
    w_ih = params["w_ih"]                  # (L, H, H)  PyTorch layout (out, in)
    w_hh = params["w_hh"]                  # (L, H, H)
    b_ih = params["b_ih"]                  # (L, H)
    b_hh = params["b_hh"]                  # (L, H)
    w_fc = params["w_fc"]                  # (O, H)
    b_fc = params["b_fc"]                  # (O,)

    B, T = token_ids.shape
    L, _, H = hidden.shape
    O = w_fc.shape[0]

    # Glue: fold embedding + layer-0 input projection + layer-0 biases into one
    # table, then a single data-dependent gather delivers the pre-activations.
    proj_tbl = (jnp.dot(emb_tbl, w_ih[0].T, preferred_element_type=jnp.float32)
                + b_ih[0] + b_hh[0])                              # (V, H)
    xp = jnp.take(proj_tbl, token_ids, axis=0)                    # (B, T, H)

    w_ih_t = jnp.transpose(w_ih, (0, 2, 1))                       # used for layers >= 1
    w_hh_t = jnp.transpose(w_hh, (0, 2, 1))
    b_sum = (b_ih + b_hh).reshape(L, 1, H)                        # used for layers >= 1
    w_fc_t = jnp.transpose(w_fc, (1, 0))                          # (H, O)
    b_fc_r = b_fc.reshape(1, O)

    full = lambda shape: pl.BlockSpec(shape, lambda i: (0,) * len(shape))

    y, h_out = pl.pallas_call(
        functools.partial(_char_rnn_kernel, n_layers=L, seq_len=T),
        out_shape=(
            jax.ShapeDtypeStruct((B * T, O), jnp.float32),
            jax.ShapeDtypeStruct((L, B, H), jnp.float32),
        ),
        grid_spec=pltpu.PrefetchScalarGridSpec(
            num_scalar_prefetch=0,
            grid=(1,),                                            # single invocation
            in_specs=[
                full((B, T, H)),                                  # pre-projected inputs
                full((L, B, H)),                                  # h0
                full((L, H, H)),                                  # W_ih^T (layers >= 1)
                full((L, H, H)),                                  # W_hh^T
                full((L, 1, H)),                                  # b_ih + b_hh (layers >= 1)
                full((H, O)),                                     # W_fc^T
                full((1, O)),                                     # b_fc
            ],
            out_specs=[
                full((B * T, O)),                                 # logits, PyTorch layout
                full((L, B, H)),                                  # final hidden
            ],
            scratch_shapes=[
                pltpu.VMEM((B, T, H), jnp.float32),               # top-layer h_t slab
            ],
        ),
        compiler_params=pltpu.CompilerParams(
            dimension_semantics=("arbitrary",),
        ),
    )(xp, hidden, w_ih_t, w_hh_t, b_sum, w_fc_t, b_fc_r)

    return y, h_out


def _reference_forward(token_ids, hidden, params):
    """Pure-JAX reference (same math as PyTorch CharRNN.forward)."""
    emb = jnp.take(params["embedding"], token_ids, axis=0)         # (B, T, H)
    L = hidden.shape[0]
    h = [hidden[l] for l in range(L)]
    outs = []
    T = token_ids.shape[1]
    for t in range(T):
        x = emb[:, t, :]
        for l in range(L):
            x = jnp.tanh(x @ params["w_ih"][l].T + params["b_ih"][l]
                         + h[l] @ params["w_hh"][l].T + params["b_hh"][l])
            h[l] = x
        outs.append(x)
    out = jnp.stack(outs, axis=1)                                  # (B, T, H)
    B, T, H = out.shape
    out = out.reshape(B * T, H) @ params["w_fc"].T + params["b_fc"]
    return out, jnp.stack(h, axis=0)


def init_params(key, input_size, hidden_size, output_size, n_layers):
    ks = jax.random.split(key, 7)
    bound = 1.0 / jnp.sqrt(hidden_size)
    u = lambda k, shape: jax.random.uniform(k, shape, jnp.float32, -bound, bound)
    return {
        "embedding": jax.random.normal(ks[0], (input_size, hidden_size), jnp.float32),
        "w_ih": u(ks[1], (n_layers, hidden_size, hidden_size)),
        "w_hh": u(ks[2], (n_layers, hidden_size, hidden_size)),
        "b_ih": u(ks[3], (n_layers, hidden_size)),
        "b_hh": u(ks[4], (n_layers, hidden_size)),
        "w_fc": u(ks[5], (output_size, hidden_size)),
        "b_fc": u(ks[6], (output_size,)),
    }


if __name__ == "__main__":
    input_size = 16     # vocab
    hidden_size = 32
    output_size = 16
    n_layers = 1
    batch = 2
    seq = 8

    key = jax.random.PRNGKey(0)
    k_par, k_tok = jax.random.split(key)
    params = init_params(k_par, input_size, hidden_size, output_size, n_layers)

    token_ids = jax.random.randint(k_tok, (batch, seq), 0, input_size, dtype=jnp.int32)
    hidden0 = jnp.zeros((n_layers, batch, hidden_size), jnp.float32)  # init_hidden

    out, h_final = char_rnn_forward(token_ids, hidden0, params)
    out = jax.block_until_ready(out)
    h_final = jax.block_until_ready(h_final)

    ref_out, ref_h = _reference_forward(token_ids, hidden0, params)
    assert out.shape == (batch * seq, output_size)
    assert h_final.shape == (n_layers, batch, hidden_size)
    assert jnp.allclose(out, ref_out, atol=1e-4, rtol=1e-4)
    assert jnp.allclose(h_final, ref_h, atol=1e-4, rtol=1e-4)

    print("KERNEL_OK")
</pallas_src>

<mosaic_0001>
module attributes {stable_mosaic.version = 11 : i64} {
  func.func @_char_rnn_kernel(%arg0: i32, %arg1: memref<2x8x32xf32, #tpu.memory_space<vmem>>, %arg2: memref<1x2x32xf32, #tpu.memory_space<vmem>>, %arg3: memref<1x32x32xf32, #tpu.memory_space<vmem>>, %arg4: memref<1x32x32xf32, #tpu.memory_space<vmem>>, %arg5: memref<1x1x32xf32, #tpu.memory_space<vmem>>, %arg6: memref<32x16xf32, #tpu.memory_space<vmem>>, %arg7: memref<1x16xf32, #tpu.memory_space<vmem>>, %arg8: memref<16x16xf32, #tpu.memory_space<vmem>>, %arg9: memref<1x2x32xf32, #tpu.memory_space<vmem>>, %arg10: memref<2x8x32xf32, #tpu.memory_space<vmem>>) attributes {dimension_semantics = [#tpu.dimension_semantics<arbitrary>], iteration_bounds = array<i64: 1>, scalar_prefetch = 0 : i64, scratch_operands = 1 : i64, tpu.core_type = #tpu.core_type<tc>, window_params = [{pipeline_mode = #tpu.pipeline_mode<synchronous>, transform_indices = @transform_0, window_bounds = array<i64: 2, 8, 32>}, {pipeline_mode = #tpu.pipeline_mode<synchronous>, transform_indices = @transform_1, window_bounds = array<i64: 1, 2, 32>}, {pipeline_mode = #tpu.pipeline_mode<synchronous>, transform_indices = @transform_2, window_bounds = array<i64: 1, 32, 32>}, {pipeline_mode = #tpu.pipeline_mode<synchronous>, transform_indices = @transform_3, window_bounds = array<i64: 1, 32, 32>}, {pipeline_mode = #tpu.pipeline_mode<synchronous>, transform_indices = @transform_4, window_bounds = array<i64: 1, 1, 32>}, {pipeline_mode = #tpu.pipeline_mode<synchronous>, transform_indices = @transform_5, window_bounds = array<i64: 32, 16>}, {pipeline_mode = #tpu.pipeline_mode<synchronous>, transform_indices = @transform_6, window_bounds = array<i64: 1, 16>}, {pipeline_mode = #tpu.pipeline_mode<synchronous>, transform_indices = @transform_7, window_bounds = array<i64: 16, 16>}, {pipeline_mode = #tpu.pipeline_mode<synchronous>, transform_indices = @transform_8, window_bounds = array<i64: 1, 2, 32>}]} {
    %c0 = arith.constant 0 : index
    %c0_0 = arith.constant 0 : index
    %c0_1 = arith.constant 0 : index
    %0 = vector.load %arg2[%c0, %c0_0, %c0_1] : memref<1x2x32xf32, #tpu.memory_space<vmem>>, vector<1x2x32xf32>
    %1 = vector.shape_cast %0 : vector<1x2x32xf32> to vector<2x32xf32>
    %c0_2 = arith.constant 0 : index
    %c0_3 = arith.constant 0 : index
    %c0_4 = arith.constant 0 : index
    %2 = vector.load %arg1[%c0_2, %c0_3, %c0_4] : memref<2x8x32xf32, #tpu.memory_space<vmem>>, vector<2x1x32xf32>
    %3 = vector.shape_cast %2 : vector<2x1x32xf32> to vector<2x32xf32>
    %c0_5 = arith.constant 0 : index
    %c0_6 = arith.constant 0 : index
    %c0_7 = arith.constant 0 : index
    %4 = vector.load %arg4[%c0_5, %c0_6, %c0_7] : memref<1x32x32xf32, #tpu.memory_space<vmem>>, vector<1x32x32xf32>
    %5 = vector.shape_cast %4 : vector<1x32x32xf32> to vector<32x32xf32>
    %cst = arith.constant dense<0.000000e+00> : vector<2x32xf32>
    %6 = tpu.matmul %1, %5, %cst {dimension_numbers = #tpu.dot_dimension_numbers<[1], [0], [0], [1], [0, 0, 1, 1], [], []>} : vector<2x32xf32>, vector<32x32xf32>, vector<2x32xf32> -> vector<2x32xf32>
    %7 = arith.addf %3, %6 : vector<2x32xf32>
    %8 = math.tanh %7 : vector<2x32xf32>
    %c0_8 = arith.constant 0 : index
    %c0_9 = arith.constant 0 : index
    %c0_10 = arith.constant 0 : index
    %9 = vector.load %arg10[%c0_8, %c0_9, %c0_10] : memref<2x8x32xf32, #tpu.memory_space<vmem>>, vector<2x1x32xf32>
    %10 = vector.shape_cast %9 : vector<2x1x32xf32> to vector<2x32xf32>
    %11 = vector.shape_cast %8 : vector<2x32xf32> to vector<2x1x32xf32>
    tpu.vector_store %arg10[%c0_8, %c0_9, %c0_10], %11 {strides = array<i32>} : memref<2x8x32xf32, #tpu.memory_space<vmem>>, vector<2x1x32xf32>,
    %c0_11 = arith.constant 0 : index
    %c1 = arith.constant 1 : index
    %c0_12 = arith.constant 0 : index
    %12 = vector.load %arg1[%c0_11, %c1, %c0_12] : memref<2x8x32xf32, #tpu.memory_space<vmem>>, vector<2x1x32xf32>
    %13 = vector.shape_cast %12 : vector<2x1x32xf32> to vector<2x32xf32>
    %c0_13 = arith.constant 0 : index
    %c0_14 = arith.constant 0 : index
    %c0_15 = arith.constant 0 : index
    %14 = vector.load %arg4[%c0_13, %c0_14, %c0_15] : memref<1x32x32xf32, #tpu.memory_space<vmem>>, vector<1x32x32xf32>
    %15 = vector.shape_cast %14 : vector<1x32x32xf32> to vector<32x32xf32>
    %cst_16 = arith.constant dense<0.000000e+00> : vector<2x32xf32>
    %16 = tpu.matmul %8, %15, %cst_16 {dimension_numbers = #tpu.dot_dimension_numbers<[1], [0], [0], [1], [0, 0, 1, 1], [], []>} : vector<2x32xf32>, vector<32x32xf32>, vector<2x32xf32> -> vector<2x32xf32>
    %17 = arith.addf %13, %16 : vector<2x32xf32>
    %18 = math.tanh %17 : vector<2x32xf32>
    %c0_17 = arith.constant 0 : index
    %c1_18 = arith.constant 1 : index
    %c0_19 = arith.constant 0 : index
    %19 = vector.load %arg10[%c0_17, %c1_18, %c0_19] : memref<2x8x32xf32, #tpu.memory_space<vmem>>, vector<2x1x32xf32>
    %20 = vector.shape_cast %19 : vector<2x1x32xf32> to vector<2x32xf32>
    %21 = vector.shape_cast %18 : vector<2x32xf32> to vector<2x1x32xf32>
    tpu.vector_store %arg10[%c0_17, %c1_18, %c0_19], %21 {strides = array<i32>} : memref<2x8x32xf32, #tpu.memory_space<vmem>>, vector<2x1x32xf32>,
    %c0_20 = arith.constant 0 : index
    %c2 = arith.constant 2 : index
    %c0_21 = arith.constant 0 : index
    %22 = vector.load %arg1[%c0_20, %c2, %c0_21] : memref<2x8x32xf32, #tpu.memory_space<vmem>>, vector<2x1x32xf32>
    %23 = vector.shape_cast %22 : vector<2x1x32xf32> to vector<2x32xf32>
    %c0_22 = arith.constant 0 : index
    %c0_23 = arith.constant 0 : index
    %c0_24 = arith.constant 0 : index
    %24 = vector.load %arg4[%c0_22, %c0_23, %c0_24] : memref<1x32x32xf32, #tpu.memory_space<vmem>>, vector<1x32x32xf32>
    %25 = vector.shape_cast %24 : vector<1x32x32xf32> to vector<32x32xf32>
    %cst_25 = arith.constant dense<0.000000e+00> : vector<2x32xf32>
    %26 = tpu.matmul %18, %25, %cst_25 {dimension_numbers = #tpu.dot_dimension_numbers<[1], [0], [0], [1], [0, 0, 1, 1], [], []>} : vector<2x32xf32>, vector<32x32xf32>, vector<2x32xf32> -> vector<2x32xf32>
    %27 = arith.addf %23, %26 : vector<2x32xf32>
    %28 = math.tanh %27 : vector<2x32xf32>
    %c0_26 = arith.constant 0 : index
    %c2_27 = arith.constant 2 : index
    %c0_28 = arith.constant 0 : index
    %29 = vector.load %arg10[%c0_26, %c2_27, %c0_28] : memref<2x8x32xf32, #tpu.memory_space<vmem>>, vector<2x1x32xf32>
    %30 = vector.shape_cast %29 : vector<2x1x32xf32> to vector<2x32xf32>
    %31 = vector.shape_cast %28 : vector<2x32xf32> to vector<2x1x32xf32>
    tpu.vector_store %arg10[%c0_26, %c2_27, %c0_28], %31 {strides = array<i32>} : memref<2x8x32xf32, #tpu.memory_space<vmem>>, vector<2x1x32xf32>,
    %c0_29 = arith.constant 0 : index
    %c3 = arith.constant 3 : index
    %c0_30 = arith.constant 0 : index
    %32 = vector.load %arg1[%c0_29, %c3, %c0_30] : memref<2x8x32xf32, #tpu.memory_space<vmem>>, vector<2x1x32xf32>
    %33 = vector.shape_cast %32 : vector<2x1x32xf32> to vector<2x32xf32>
    %c0_31 = arith.constant 0 : index
    %c0_32 = arith.constant 0 : index
    %c0_33 = arith.constant 0 : index
    %34 = vector.load %arg4[%c0_31, %c0_32, %c0_33] : memref<1x32x32xf32, #tpu.memory_space<vmem>>, vector<1x32x32xf32>
    %35 = vector.shape_cast %34 : vector<1x32x32xf32> to vector<32x32xf32>
    %cst_34 = arith.constant dense<0.000000e+00> : vector<2x32xf32>
    %36 = tpu.matmul %28, %35, %cst_34 {dimension_numbers = #tpu.dot_dimension_numbers<[1], [0], [0], [1], [0, 0, 1, 1], [], []>} : vector<2x32xf32>, vector<32x32xf32>, vector<2x32xf32> -> vector<2x32xf32>
    %37 = arith.addf %33, %36 : vector<2x32xf32>
    %38 = math.tanh %37 : vector<2x32xf32>
    %c0_35 = arith.constant 0 : index
    %c3_36 = arith.constant 3 : index
    %c0_37 = arith.constant 0 : index
    %39 = vector.load %arg10[%c0_35, %c3_36, %c0_37] : memref<2x8x32xf32, #tpu.memory_space<vmem>>, vector<2x1x32xf32>
    %40 = vector.shape_cast %39 : vector<2x1x32xf32> to vector<2x32xf32>
    %41 = vector.shape_cast %38 : vector<2x32xf32> to vector<2x1x32xf32>
    tpu.vector_store %arg10[%c0_35, %c3_36, %c0_37], %41 {strides = array<i32>} : memref<2x8x32xf32, #tpu.memory_space<vmem>>, vector<2x1x32xf32>,
    %c0_38 = arith.constant 0 : index
    %c4 = arith.constant 4 : index
    %c0_39 = arith.constant 0 : index
    %42 = vector.load %arg1[%c0_38, %c4, %c0_39] : memref<2x8x32xf32, #tpu.memory_space<vmem>>, vector<2x1x32xf32>
    %43 = vector.shape_cast %42 : vector<2x1x32xf32> to vector<2x32xf32>
    %c0_40 = arith.constant 0 : index
    %c0_41 = arith.constant 0 : index
    %c0_42 = arith.constant 0 : index
    %44 = vector.load %arg4[%c0_40, %c0_41, %c0_42] : memref<1x32x32xf32, #tpu.memory_space<vmem>>, vector<1x32x32xf32>
    %45 = vector.shape_cast %44 : vector<1x32x32xf32> to vector<32x32xf32>
    %cst_43 = arith.constant dense<0.000000e+00> : vector<2x32xf32>
    %46 = tpu.matmul %38, %45, %cst_43 {dimension_numbers = #tpu.dot_dimension_numbers<[1], [0], [0], [1], [0, 0, 1, 1], [], []>} : vector<2x32xf32>, vector<32x32xf32>, vector<2x32xf32> -> vector<2x32xf32>
    %47 = arith.addf %43, %46 : vector<2x32xf32>
    %48 = math.tanh %47 : vector<2x32xf32>
    %c0_44 = arith.constant 0 : index
    %c4_45 = arith.constant 4 : index
    %c0_46 = arith.constant 0 : index
    %49 = vector.load %arg10[%c0_44, %c4_45, %c0_46] : memref<2x8x32xf32, #tpu.memory_space<vmem>>, vector<2x1x32xf32>
    %50 = vector.shape_cast %49 : vector<2x1x32xf32> to vector<2x32xf32>
    %51 = vector.shape_cast %48 : vector<2x32xf32> to vector<2x1x32xf32>
    tpu.vector_store %arg10[%c0_44, %c4_45, %c0_46], %51 {strides = array<i32>} : memref<2x8x32xf32, #tpu.memory_space<vmem>>, vector<2x1x32xf32>,
    %c0_47 = arith.constant 0 : index
    %c5 = arith.constant 5 : index
    %c0_48 = arith.constant 0 : index
    %52 = vector.load %arg1[%c0_47, %c5, %c0_48] : memref<2x8x32xf32, #tpu.memory_space<vmem>>, vector<2x1x32xf32>
    %53 = vector.shape_cast %52 : vector<2x1x32xf32> to vector<2x32xf32>
    %c0_49 = arith.constant 0 : index
    %c0_50 = arith.constant 0 : index
    %c0_51 = arith.constant 0 : index
    %54 = vector.load %arg4[%c0_49, %c0_50, %c0_51] : memref<1x32x32xf32, #tpu.memory_space<vmem>>, vector<1x32x32xf32>
    %55 = vector.shape_cast %54 : vector<1x32x32xf32> to vector<32x32xf32>
    %cst_52 = arith.constant dense<0.000000e+00> : vector<2x32xf32>
    %56 = tpu.matmul %48, %55, %cst_52 {dimension_numbers = #tpu.dot_dimension_numbers<[1], [0], [0], [1], [0, 0, 1, 1], [], []>} : vector<2x32xf32>, vector<32x32xf32>, vector<2x32xf32> -> vector<2x32xf32>
    %57 = arith.addf %53, %56 : vector<2x32xf32>
    %58 = math.tanh %57 : vector<2x32xf32>
    %c0_53 = arith.constant 0 : index
    %c5_54 = arith.constant 5 : index
    %c0_55 = arith.constant 0 : index
    %59 = vector.load %arg10[%c0_53, %c5_54, %c0_55] : memref<2x8x32xf32, #tpu.memory_space<vmem>>, vector<2x1x32xf32>
    %60 = vector.shape_cast %59 : vector<2x1x32xf32> to vector<2x32xf32>
    %61 = vector.shape_cast %58 : vector<2x32xf32> to vector<2x1x32xf32>
    tpu.vector_store %arg10[%c0_53, %c5_54, %c0_55], %61 {strides = array<i32>} : memref<2x8x32xf32, #tpu.memory_space<vmem>>, vector<2x1x32xf32>,
    %c0_56 = arith.constant 0 : index
    %c6 = arith.constant 6 : index
    %c0_57 = arith.constant 0 : index
    %62 = vector.load %arg1[%c0_56, %c6, %c0_57] : memref<2x8x32xf32, #tpu.memory_space<vmem>>, vector<2x1x32xf32>
    %63 = vector.shape_cast %62 : vector<2x1x32xf32> to vector<2x32xf32>
    %c0_58 = arith.constant 0 : index
    %c0_59 = arith.constant 0 : index
    %c0_60 = arith.constant 0 : index
    %64 = vector.load %arg4[%c0_58, %c0_59, %c0_60] : memref<1x32x32xf32, #tpu.memory_space<vmem>>, vector<1x32x32xf32>
    %65 = vector.shape_cast %64 : vector<1x32x32xf32> to vector<32x32xf32>
    %cst_61 = arith.constant dense<0.000000e+00> : vector<2x32xf32>
    %66 = tpu.matmul %58, %65, %cst_61 {dimension_numbers = #tpu.dot_dimension_numbers<[1], [0], [0], [1], [0, 0, 1, 1], [], []>} : vector<2x32xf32>, vector<32x32xf32>, vector<2x32xf32> -> vector<2x32xf32>
    %67 = arith.addf %63, %66 : vector<2x32xf32>
    %68 = math.tanh %67 : vector<2x32xf32>
    %c0_62 = arith.constant 0 : index
    %c6_63 = arith.constant 6 : index
    %c0_64 = arith.constant 0 : index
    %69 = vector.load %arg10[%c0_62, %c6_63, %c0_64] : memref<2x8x32xf32, #tpu.memory_space<vmem>>, vector<2x1x32xf32>
    %70 = vector.shape_cast %69 : vector<2x1x32xf32> to vector<2x32xf32>
    %71 = vector.shape_cast %68 : vector<2x32xf32> to vector<2x1x32xf32>
    tpu.vector_store %arg10[%c0_62, %c6_63, %c0_64], %71 {strides = array<i32>} : memref<2x8x32xf32, #tpu.memory_space<vmem>>, vector<2x1x32xf32>,
    %c0_65 = arith.constant 0 : index
    %c7 = arith.constant 7 : index
    %c0_66 = arith.constant 0 : index
    %72 = vector.load %arg1[%c0_65, %c7, %c0_66] : memref<2x8x32xf32, #tpu.memory_space<vmem>>, vector<2x1x32xf32>
    %73 = vector.shape_cast %72 : vector<2x1x32xf32> to vector<2x32xf32>
    %c0_67 = arith.constant 0 : index
    %c0_68 = arith.constant 0 : index
    %c0_69 = arith.constant 0 : index
    %74 = vector.load %arg4[%c0_67, %c0_68, %c0_69] : memref<1x32x32xf32, #tpu.memory_space<vmem>>, vector<1x32x32xf32>
    %75 = vector.shape_cast %74 : vector<1x32x32xf32> to vector<32x32xf32>
    %cst_70 = arith.constant dense<0.000000e+00> : vector<2x32xf32>
    %76 = tpu.matmul %68, %75, %cst_70 {dimension_numbers = #tpu.dot_dimension_numbers<[1], [0], [0], [1], [0, 0, 1, 1], [], []>} : vector<2x32xf32>, vector<32x32xf32>, vector<2x32xf32> -> vector<2x32xf32>
    %77 = arith.addf %73, %76 : vector<2x32xf32>
    %78 = math.tanh %77 : vector<2x32xf32>
    %c0_71 = arith.constant 0 : index
    %c7_72 = arith.constant 7 : index
    %c0_73 = arith.constant 0 : index
    %79 = vector.load %arg10[%c0_71, %c7_72, %c0_73] : memref<2x8x32xf32, #tpu.memory_space<vmem>>, vector<2x1x32xf32>
    %80 = vector.shape_cast %79 : vector<2x1x32xf32> to vector<2x32xf32>
    %81 = vector.shape_cast %78 : vector<2x32xf32> to vector<2x1x32xf32>
    tpu.vector_store %arg10[%c0_71, %c7_72, %c0_73], %81 {strides = array<i32>} : memref<2x8x32xf32, #tpu.memory_space<vmem>>, vector<2x1x32xf32>,
    %c0_74 = arith.constant 0 : index
    %c0_75 = arith.constant 0 : index
    %c0_76 = arith.constant 0 : index
    %82 = vector.load %arg10[%c0_74, %c0_75, %c0_76] : memref<2x8x32xf32, #tpu.memory_space<vmem>>, vector<2x8x32xf32>
    %83 = vector.shape_cast %82 : vector<2x8x32xf32> to vector<16x32xf32>
    %c0_77 = arith.constant 0 : index
    %c0_78 = arith.constant 0 : index
    %84 = vector.load %arg6[%c0_77, %c0_78] : memref<32x16xf32, #tpu.memory_space<vmem>>, vector<32x16xf32>
    %cst_79 = arith.constant dense<0.000000e+00> : vector<16x16xf32>
    %85 = tpu.matmul %83, %84, %cst_79 {dimension_numbers = #tpu.dot_dimension_numbers<[1], [0], [0], [1], [0, 0, 1, 1], [], []>} : vector<16x32xf32>, vector<32x16xf32>, vector<16x16xf32> -> vector<16x16xf32>
    %c0_80 = arith.constant 0 : index
    %c0_81 = arith.constant 0 : index
    %86 = vector.load %arg7[%c0_80, %c0_81] : memref<1x16xf32, #tpu.memory_space<vmem>>, vector<1x16xf32>
    %87 = vector.broadcast %86 : vector<1x16xf32> to vector<16x16xf32>
    %88 = arith.addf %85, %87 : vector<16x16xf32>
    %c0_82 = arith.constant 0 : index
    %c0_83 = arith.constant 0 : index
    %89 = vector.load %arg8[%c0_82, %c0_83] : memref<16x16xf32, #tpu.memory_space<vmem>>, vector<16x16xf32>
    tpu.vector_store %arg8[%c0_82, %c0_83], %88 {strides = array<i32>} : memref<16x16xf32, #tpu.memory_space<vmem>>, vector<16x16xf32>,
    %c0_84 = arith.constant 0 : index
    %c0_85 = arith.constant 0 : index
    %c0_86 = arith.constant 0 : index
    %90 = vector.load %arg9[%c0_84, %c0_85, %c0_86] : memref<1x2x32xf32, #tpu.memory_space<vmem>>, vector<1x2x32xf32>
    %91 = vector.shape_cast %90 : vector<1x2x32xf32> to vector<2x32xf32>
    %92 = vector.shape_cast %78 : vector<2x32xf32> to vector<1x2x32xf32>
    tpu.vector_store %arg9[%c0_84, %c0_85, %c0_86], %92 {strides = array<i32>} : memref<1x2x32xf32, #tpu.memory_space<vmem>>, vector<1x2x32xf32>,
    return
  }
  func.func @transform_0(%arg0: i32) -> (i32, i32, i32) {
    %c0_i32 = arith.constant 0 : i32
    %c0_i32_0 = arith.constant 0 : i32
    %c0_i32_1 = arith.constant 0 : i32
    %c0_i32_2 = arith.constant 0 : i32
    return %c0_i32, %c0_i32_0, %c0_i32_1 : i32, i32, i32
  }
  func.func @transform_1(%arg0: i32) -> (i32, i32, i32) {
    %c0_i32 = arith.constant 0 : i32
    %c0_i32_0 = arith.constant 0 : i32
    %c0_i32_1 = arith.constant 0 : i32
    %c0_i32_2 = arith.constant 0 : i32
    return %c0_i32, %c0_i32_0, %c0_i32_1 : i32, i32, i32
  }
  func.func @transform_2(%arg0: i32) -> (i32, i32, i32) {
    %c0_i32 = arith.constant 0 : i32
    %c0_i32_0 = arith.constant 0 : i32
    %c0_i32_1 = arith.constant 0 : i32
    %c0_i32_2 = arith.constant 0 : i32
    return %c0_i32, %c0_i32_0, %c0_i32_1 : i32, i32, i32
  }
  func.func @transform_3(%arg0: i32) -> (i32, i32, i32) {
    %c0_i32 = arith.constant 0 : i32
    %c0_i32_0 = arith.constant 0 : i32
    %c0_i32_1 = arith.constant 0 : i32
    %c0_i32_2 = arith.constant 0 : i32
    return %c0_i32, %c0_i32_0, %c0_i32_1 : i32, i32, i32
  }
  func.func @transform_4(%arg0: i32) -> (i32, i32, i32) {
    %c0_i32 = arith.constant 0 : i32
    %c0_i32_0 = arith.constant 0 : i32
    %c0_i32_1 = arith.constant 0 : i32
    %c0_i32_2 = arith.constant 0 : i32
    return %c0_i32, %c0_i32_0, %c0_i32_1 : i32, i32, i32
  }
  func.func @transform_5(%arg0: i32) -> (i32, i32) {
    %c0_i32 = arith.constant 0 : i32
    %c0_i32_0 = arith.constant 0 : i32
    %c0_i32_1 = arith.constant 0 : i32
    return %c0_i32, %c0_i32_0 : i32, i32
  }
  func.func @transform_6(%arg0: i32) -> (i32, i32) {
    %c0_i32 = arith.constant 0 : i32
    %c0_i32_0 = arith.constant 0 : i32
    %c0_i32_1 = arith.constant 0 : i32
    return %c0_i32, %c0_i32_0 : i32, i32
  }
  func.func @transform_7(%arg0: i32) -> (i32, i32) {
    %c0_i32 = arith.constant 0 : i32
    %c0_i32_0 = arith.constant 0 : i32
    %c0_i32_1 = arith.constant 0 : i32
    return %c0_i32, %c0_i32_0 : i32, i32
  }
  func.func @transform_8(%arg0: i32) -> (i32, i32, i32) {
    %c0_i32 = arith.constant 0 : i32
    %c0_i32_0 = arith.constant 0 : i32
    %c0_i32_1 = arith.constant 0 : i32
    %c0_i32_2 = arith.constant 0 : i32
    return %c0_i32, %c0_i32_0, %c0_i32_1 : i32, i32, i32
  }
}

</mosaic_0001>

<bundles_post_ra>
// kernel: tpu_custom_call.1
= control target key start
LH: loop header
LB: loop body
LE: loop exit
PB: predicated region body
PF: predicated region fallthrough
CT: control target
= control target key end

     0   :  { %14 = vsyncpa [#allocation4], 0  ;;  %s801_s0 = inlined_call_operand.vmem [shape: f32[2,8,32], index: 0, kind: input, shape index: {}]   ;;  %s802_s1 = inlined_call_operand.hbm [shape: f32[1,2,32], index: 1, kind: input, shape index: {}]   ;;  %s803_s2 = inlined_call_operand.vmem [shape: f32[1,32,32], index: 2, kind: input, shape index: {}]   ;;  %s804_s3 = inlined_call_operand.hbm [shape: f32[1,32,32], index: 3, kind: input, shape index: {}]   ;;  %s805_s4 = inlined_call_operand.vmem [shape: f32[1,1,32], index: 4, kind: input, shape index: {}]   ;;  %s806_s5 = inlined_call_operand.vmem [shape: f32[32,16], index: 5, kind: input, shape index: {}]   ;;  %s807_s6 = inlined_call_operand.vmem [shape: f32[1,16], index: 6, kind: input, shape index: {}]   ;;  %s808_s7 = inlined_call_operand.hbm [shape: f32[16,16], index: 7, kind: output, shape index: {0}]   ;;  %s809_s8 = inlined_call_operand.hbm [shape: f32[1,2,32], index: 8, kind: output, shape index: {1}]  }
   0x1   :  { %15 = vsyncpa [#allocation7], 0 }
   0x2   :  { %16 = vsyncpa [#allocation5], 0 }
   0x3   :  { %17 = vsyncpa [#allocation10], 0  ;;  %s25_s4 = sshll.u32 %s802_s1, 4  ;;  %s635_s28 = smov [#allocation3]   ;;  %s26_s4 = int_to_ptr.hbm [resolvable:$true] %s25_s4 }
   0x4   :  { %s27_s29 = sshll.u32 %s635_s28, 4  ;;  %s37_s10 = sshll.u32 %s804_s3, 4  ;;  %s28_s29 = int_to_ptr.vmem [resolvable:$true] %s27_s29  ;;  %s38_s10 = int_to_ptr.hbm [resolvable:$true] %s37_s10 }
   0x5   :  { %30 = dma.hbm_to_vmem [thread:$0]  %s26_s4, 32, %s28_s29, [#allocation4]  }
   0x6   :  { %s636_s11 = smov [#allocation6]   ;;  %s637_s13 = smov 128  }
   0x7   :  { %s39_s12 = sshll.u32 %s636_s11, 4  ;;  %s638_s14 = smov 8   ;;  %s40_s12 = int_to_ptr.vmem [resolvable:$true] %s39_s12 }
   0x8   :  { %45 = dma.hbm_to_vmem [thread:$0]  %s38_s10, 512, %s40_s12, [#allocation7], %s637_s13, %s637_s13, %s638_s14  }
   0x9   :  { %627 = dma.done.wait [#allocation4], 32  }
   0xa   :  { %628 = vsyncadd [#allocation4], 4294967264 }
   0xb   :  { %629 = dma.done.wait [#allocation7], 512  }
   0xc   :  { %630 = vsyncadd [#allocation7], 4294966784  ;;  %v66_v0 = vld [vmem:[#allocation6 + $0x18] sm:$0xff]  ;;  %v65_v1 = vld [vmem:[#allocation6 + $0x10] sm:$0xff]  ;;  %vm67_vm0 = vcmask 261120   ;;  %vm99_vm1 = vcmask 253952  }
   0xd   :  { %83 = vmatpush.msra.mxu1 %v66_v0  ;;  %169 = vmatpush.msra.mxu2 %v66_v0  ;;  %v64_v2 = vld [vmem:[#allocation6 + $0x8] sm:$0xff]  ;;  %v63_v3 = vld [vmem:[#allocation6] sm:$0xff]  ;;  %v60_v4 = vld [vmem:[#allocation3] sm:$0x3]  ;;  %vm111_vm2 = vcmask 1041409   ;;  %vm444_vm3 = vcmask 254976  }
   0xe   :  { %211 = vmatpush.msra.mxu3 %v66_v0  ;;  %253 = vmatpush.msra.mxu0 %v66_v0  ;;  %v61_v5 = vld [vmem:[%s801_s0] sm:$0x1]  ;;  %v62_v6 = vld [vmem:[%s801_s0 + $0x8] sm:$0x1]  ;;  %v102_v15 = vld [vmem:[%s801_s0 + $0x1] sm:$0x1] }
   0xf   :  { %84 = vmatpush.msra.mxu1 %v65_v1  ;;  %170 = vmatpush.msra.mxu2 %v65_v1  ;;  %v103_v16 = vld [vmem:[%s801_s0 + $0x9] sm:$0x1]  ;;  %v145_v25 = vld [vmem:[%s801_s0 + $0x2] sm:$0x1]  ;;  %v146_v26 = vld [vmem:[%s801_s0 + $0xa] sm:$0x1] }
  0x10   :  { %212 = vmatpush.msra.mxu3 %v65_v1  ;;  %254 = vmatpush.msra.mxu0 %v65_v1  ;;  %v187_v35 = vld [vmem:[%s801_s0 + $0x3] sm:$0x1]  ;;  %v188_v36 = vld [vmem:[%s801_s0 + $0xb] sm:$0x1]  ;;  %v229_v45 = vld [vmem:[%s801_s0 + $0x4] sm:$0x1] }
  0x11   :  { %85 = vmatpush.msra.mxu1 %v64_v2  ;;  %171 = vmatpush.msra.mxu2 %v64_v2  ;;  %v230_v46 = vld [vmem:[%s801_s0 + $0xc] sm:$0x1]  ;;  %v271_v55 = vld [vmem:[%s801_s0 + $0x5] sm:$0x1]  ;;  %v272_v56 = vld [vmem:[%s801_s0 + $0xd] sm:$0x1] }
  0x12   :  { %213 = vmatpush.msra.mxu3 %v64_v2  ;;  %255 = vmatpush.msra.mxu0 %v64_v2  ;;  %s466_s29 = sshll.u32 %s809_s8, 4  ;;  %vm436_vm4 = vcmask 130048   ;;  %s640_s10 = smov [#allocation8]   ;;  %s467_s29 = int_to_ptr.hbm [resolvable:$true] %s466_s29 }
  0x13   :  { %86 = vmatpush.msra.mxu1 %v63_v3  ;;  %172 = vmatpush.msra.mxu2 %v63_v3  ;;  %s450_s11 = sshll.u32 %s640_s10, 4  ;;  %s452_s3 = sshll.u32 %s808_s7, 4  ;;  %s451_s11 = int_to_ptr.vmem [resolvable:$true] %s450_s11  ;;  %s453_s3 = int_to_ptr.hbm [resolvable:$true] %s452_s3 }
  0x14   :  { %482 = vmatmul.msk.f32.vlgmr.msra.gmra.mxu1 %vm67_vm0, %v60_v4  ;;  %214 = vmatpush.msra.mxu3 %v63_v3 }
  0x15   :  { %127 = vmatpush.msrb.mxu1 %v66_v0  ;;  %256 = vmatpush.msra.mxu0 %v63_v3 }
  0x16   :  { %337 = vmatpush.msrb.mxu2 %v66_v0  ;;  %379 = vmatpush.msrb.mxu3 %v66_v0 }
  0x17   :  { %128 = vmatpush.msrb.mxu1 %v65_v1 }
  0x18   :  { %338 = vmatpush.msrb.mxu2 %v65_v1  ;;  %380 = vmatpush.msrb.mxu3 %v65_v1 }
  0x19   :  { %129 = vmatpush.msrb.mxu1 %v64_v2 }
  0x1a   :  { %339 = vmatpush.msrb.mxu2 %v64_v2  ;;  %381 = vmatpush.msrb.mxu3 %v64_v2 }
  0x1b   :  { %130 = vmatpush.msrb.mxu1 %v63_v3 }
  0x1c   :  { %340 = vmatpush.msrb.mxu2 %v63_v3  ;;  %382 = vmatpush.msrb.mxu3 %v63_v3 }
  0x1d   :  { %295 = vmatpush.msra.mxu1 %v66_v0 }
  0x1f   :  { %296 = vmatpush.msra.mxu1 %v65_v1  ;;  %v313_v1 = vld [vmem:[%s801_s0 + $0x6] sm:$0x1] }
  0x21   :  { %297 = vmatpush.msra.mxu1 %v64_v2  ;;  %v314_v2 = vld [vmem:[%s801_s0 + $0xe] sm:$0x1] }
  0x23   :  { %298 = vmatpush.msra.mxu1 %v63_v3 }
  0x91   :  { %v88_v7 = vpop.f32.mrf.mxu1 }
  0x92   :  { %v92_v8 = vrot.slane %v88_v7, 1  ;;  %v95_v9 = vadd.f32 %v88_v7, %v61_v5 }
  0x94   :  { %v96_v10 = vadd.f32 %v92_v8, %v62_v6  ;;  %499 = vtanh.f32 %v95_v9 }
  0x96   :  { %501 = vtanh.f32 %v96_v10 }
  0x9a   :  { %v500_v11 = vpop.eup %499 }
  0x9b   :  { %100 = vst.msk [vmem:[#allocation2] sm:$0x1] %vm99_vm1, %v500_v11 }
  0x9c   :  { %v502_v12 = vpop.eup %501 }
  0x9d   :  { %101 = vst.msk [vmem:[#allocation2 + $0x8] sm:$0x1] %vm99_vm1, %v502_v12  ;;  %v110_v13 = vrot.slane %v502_v12, 7  ;;  %v401_v12 = vld [vmem:[%s806_s5 + $0x10] sm:$0xff] }
  0x9f   :  { %v112_v14 = vsel %vm111_vm2, %v110_v13, %v500_v11  ;;  %v402_v11 = vld [vmem:[%s806_s5 + $0x18] sm:$0xff]  ;;  %v400_v13 = vld [vmem:[%s806_s5 + $0x8] sm:$0xff] }
  0xa0   :  { %483 = vmatmul.msk.f32.vlgmr.msrb.gmra.mxu1 %vm67_vm0, %v112_v14  ;;  %425 = vmatpush.msrb.mxu0 %v402_v11  ;;  %v399_v14 = vld [vmem:[%s806_s5] sm:$0xff] }
  0xa2   :  { %426 = vmatpush.msrb.mxu0 %v401_v12 }
  0xa4   :  { %427 = vmatpush.msrb.mxu0 %v400_v13 }
  0xa6   :  { %428 = vmatpush.msrb.mxu0 %v399_v14 }
 0x11d   :  { %v132_v17 = vpop.f32.mrf.mxu1 }
 0x11e   :  { %v136_v18 = vrot.slane %v132_v17, 1  ;;  %v139_v19 = vadd.f32 %v132_v17, %v102_v15  ;;  %v355_v15 = vld [vmem:[%s801_s0 + $0x7] sm:$0x1] }
 0x120   :  { %v140_v20 = vadd.f32 %v136_v18, %v103_v16  ;;  %503 = vtanh.f32 %v139_v19  ;;  %v356_v16 = vld [vmem:[%s801_s0 + $0xf] sm:$0x1]  ;;  %s639_s0 = smov [#allocation9]  }
 0x121   :  { %s464_s5 = sshll.u32 %s639_s0, 4  ;;  %s465_s5 = int_to_ptr.vmem [resolvable:$true] %s464_s5 }
 0x122   :  { %505 = vtanh.f32 %v140_v20 }
 0x126   :  { %v504_v21 = vpop.eup %503 }
 0x127   :  { %143 = vst.msk [vmem:[#allocation2 + $0x1] sm:$0x1] %vm99_vm1, %v504_v21 }
 0x128   :  { %v506_v22 = vpop.eup %505 }
 0x129   :  { %144 = vst.msk [vmem:[#allocation2 + $0x9] sm:$0x1] %vm99_vm1, %v506_v22  ;;  %v153_v23 = vrot.slane %v506_v22, 7 }
 0x12b   :  { %v154_v24 = vsel %vm111_vm2, %v153_v23, %v504_v21 }
 0x12c   :  { %484 = vmatmul.msk.f32.vlgmr.msra.gmra.mxu2 %vm67_vm0, %v154_v24 }
 0x1af   :  { %v174_v27 = vpop.f32.mrf.mxu2 }
 0x1b0   :  { %v178_v28 = vrot.slane %v174_v27, 1  ;;  %v181_v29 = vadd.f32 %v174_v27, %v145_v25  ;;  %v498_v27 = vld [vmem:[%s807_s6] ss:$0 sm:$0xff] }
 0x1b2   :  { %v182_v30 = vadd.f32 %v178_v28, %v146_v26  ;;  %507 = vtanh.f32 %v181_v29 }
 0x1b4   :  { %509 = vtanh.f32 %v182_v30 }
 0x1b8   :  { %v508_v31 = vpop.eup %507 }
 0x1b9   :  { %185 = vst.msk [vmem:[#allocation2 + $0x2] sm:$0x1] %vm99_vm1, %v508_v31 }
 0x1ba   :  { %v510_v32 = vpop.eup %509 }
 0x1bb   :  { %186 = vst.msk [vmem:[#allocation2 + $0xa] sm:$0x1] %vm99_vm1, %v510_v32  ;;  %v195_v33 = vrot.slane %v510_v32, 7 }
 0x1bd   :  { %v196_v34 = vsel %vm111_vm2, %v195_v33, %v508_v31 }
 0x1be   :  { %485 = vmatmul.msk.f32.vlgmr.msra.gmra.mxu3 %vm67_vm0, %v196_v34 }
 0x241   :  { %v216_v37 = vpop.f32.mrf.mxu3 }
 0x242   :  { %v220_v38 = vrot.slane %v216_v37, 1  ;;  %v223_v39 = vadd.f32 %v216_v37, %v187_v35 }
 0x244   :  { %v224_v40 = vadd.f32 %v220_v38, %v188_v36  ;;  %511 = vtanh.f32 %v223_v39 }
 0x246   :  { %513 = vtanh.f32 %v224_v40 }
 0x24a   :  { %v512_v41 = vpop.eup %511 }
 0x24b   :  { %227 = vst.msk [vmem:[#allocation2 + $0x3] sm:$0x1] %vm99_vm1, %v512_v41 }
 0x24c   :  { %v514_v42 = vpop.eup %513 }
 0x24d   :  { %228 = vst.msk [vmem:[#allocation2 + $0xb] sm:$0x1] %vm99_vm1, %v514_v42  ;;  %v237_v43 = vrot.slane %v514_v42, 7 }
 0x24f   :  { %v238_v44 = vsel %vm111_vm2, %v237_v43, %v512_v41 }
 0x250   :  { %486 = vmatmul.msk.f32.vlgmr.msra.gmra.mxu0 %vm67_vm0, %v238_v44 }
 0x2cd   :  { %v258_v47 = vpop.f32.mrf.mxu0 }
 0x2ce   :  { %v262_v48 = vrot.slane %v258_v47, 1  ;;  %v265_v49 = vadd.f32 %v258_v47, %v229_v45 }
 0x2d0   :  { %v266_v50 = vadd.f32 %v262_v48, %v230_v46  ;;  %515 = vtanh.f32 %v265_v49 }
 0x2d2   :  { %517 = vtanh.f32 %v266_v50 }
 0x2d6   :  { %v516_v51 = vpop.eup %515 }
 0x2d7   :  { %269 = vst.msk [vmem:[#allocation2 + $0x4] sm:$0x1] %vm99_vm1, %v516_v51 }
 0x2d8   :  { %v518_v52 = vpop.eup %517 }
 0x2d9   :  { %270 = vst.msk [vmem:[#allocation2 + $0xc] sm:$0x1] %vm99_vm1, %v518_v52  ;;  %v279_v53 = vrot.slane %v518_v52, 7 }
 0x2db   :  { %v280_v54 = vsel %vm111_vm2, %v279_v53, %v516_v51 }
 0x2dc   :  { %487 = vmatmul.msk.f32.vlgmr.msra.gmra.mxu1 %vm67_vm0, %v280_v54 }
 0x359   :  { %v300_v57 = vpop.f32.mrf.mxu1 }
 0x35a   :  { %v304_v58 = vrot.slane %v300_v57, 1  ;;  %v307_v59 = vadd.f32 %v300_v57, %v271_v55 }
 0x35c   :  { %v308_v60 = vadd.f32 %v304_v58, %v272_v56  ;;  %519 = vtanh.f32 %v307_v59 }
 0x35e   :  { %521 = vtanh.f32 %v308_v60 }
 0x362   :  { %v520_v61 = vpop.eup %519 }
 0x363   :  { %311 = vst.msk [vmem:[#allocation2 + $0x5] sm:$0x1] %vm99_vm1, %v520_v61 }
 0x364   :  { %v522_v62 = vpop.eup %521 }
 0x365   :  { %312 = vst.msk [vmem:[#allocation2 + $0xd] sm:$0x1] %vm99_vm1, %v522_v62  ;;  %v321_v63 = vrot.slane %v522_v62, 7 }
 0x367   :  { %v322_v0 = vsel %vm111_vm2, %v321_v63, %v520_v61 }
 0x368   :  { %488 = vmatmul.msk.f32.vlgmr.msrb.gmra.mxu2 %vm67_vm0, %v322_v0 }
 0x3eb   :  { %v342_v3 = vpop.f32.mrf.mxu2 }
 0x3ec   :  { %v346_v4 = vrot.slane %v342_v3, 1  ;;  %v349_v5 = vadd.f32 %v342_v3, %v313_v1 }
 0x3ee   :  { %v350_v6 = vadd.f32 %v346_v4, %v314_v2  ;;  %523 = vtanh.f32 %v349_v5 }
 0x3f0   :  { %525 = vtanh.f32 %v350_v6 }
 0x3f4   :  { %v524_v7 = vpop.eup %523 }
 0x3f5   :  { %353 = vst.msk [vmem:[#allocation2 + $0x6] sm:$0x1] %vm99_vm1, %v524_v7 }
 0x3f6   :  { %v526_v8 = vpop.eup %525 }
 0x3f7   :  { %354 = vst.msk [vmem:[#allocation2 + $0xe] sm:$0x1] %vm99_vm1, %v526_v8  ;;  %v363_v9 = vrot.slane %v526_v8, 7 }
 0x3f9   :  { %v364_v10 = vsel %vm111_vm2, %v363_v9, %v524_v7 }
 0x3fa   :  { %489 = vmatmul.msk.f32.vlgmr.msrb.gmra.mxu3 %vm67_vm0, %v364_v10 }
 0x47d   :  { %v384_v17 = vpop.f32.mrf.mxu3 }
 0x47e   :  { %v388_v18 = vrot.slane %v384_v17, 1  ;;  %v391_v19 = vadd.f32 %v384_v17, %v355_v15 }
 0x480   :  { %v392_v20 = vadd.f32 %v388_v18, %v356_v16  ;;  %527 = vtanh.f32 %v391_v19 }
 0x482   :  { %529 = vtanh.f32 %v392_v20 }
 0x486   :  { %v528_v21 = vpop.eup %527 }
 0x487   :  { %395 = vst.msk [vmem:[#allocation2 + $0x7] sm:$0x1] %vm99_vm1, %v528_v21 }
 0x488   :  { %v530_v22 = vpop.eup %529 }
 0x489   :  { %396 = vst.msk [vmem:[#allocation2 + $0xf] sm:$0x1] %vm99_vm1, %v530_v22  ;;  %v441_v23 = vrot.slane %v530_v22, 7 }
 0x48b   :  { %v442_v24 = vsel %vm111_vm2, %v441_v23, %v528_v21 }
 0x48c   :  { %445 = vst.msk [vmem:[#allocation9] sm:$0x3] %vm444_vm3, %v442_v24 }
 0x48d   :  { %469 = dma.vmem_to_hbm [thread:$0]  %s465_s5, 32, %s467_s29, [#allocation10]  }
 0x48e   :  { %v397_v25 = vld [vmem:[#allocation2] sm:$0xff] }
 0x48f   :  { %490 = vmatmul.msk.f32.vlgmr.msrb.gmra.mxu0 %vm67_vm0, %v397_v25 }
 0x490   :  { %v398_v26 = vld [vmem:[#allocation2 + $0x8] sm:$0xff] }
 0x497   :  { %491 = vmatmul.msk.f32.gmra.mxu0 %vm67_vm0, %v398_v26 }
 0x50c   :  { %v430_v28 = vpop.f32.mrf.mxu0 }
 0x50d   :  { %v431_v29 = vadd.f32 %v498_v27, %v430_v28 }
 0x50f   :  { %437 = vst.msk [vmem:[#allocation8] sm:$0xff] %vm436_vm4, %v431_v29 }
 0x514   :  { %v433_v30 = vpop.f32.mrf.mxu0 }
 0x515   :  { %v434_v31 = vadd.f32 %v498_v27, %v433_v30 }
 0x517   :  { %438 = vst.msk [vmem:[#allocation8 + $0x8] sm:$0xff] %vm436_vm4, %v434_v31 }
 0x518   :  { %458 = dma.vmem_to_hbm [thread:$0]  %s451_s11, 256, %s453_s3, [#allocation5], %s637_s13, %s637_s13, %s638_s14  }
 0x519   :  { %631 = dma.done.wait [#allocation5], 256  }
 0x51a   :  { %632 = vsyncadd [#allocation5], 4294967040 }
 0x51b   :  { %633 = dma.done.wait [#allocation10], 32  }
 0x51c   :  { %634 = vsyncadd [#allocation10], 4294967264 }
 0x51d   :  { %478 = vsyncpa [#allocation4], 1 }
 0x51e   :  { %479 = vsyncpa [#allocation7], 1 }
 0x51f   :  { %480 = vsyncpa [#allocation5], 1 }
 0x520   :  { %481 = vsyncpa [#allocation10], 1 }

</bundles_post_ra>
